<compile_context>
chip_gen: v6e
topology: v6e:2x2x1
jax: 0.10.0
libtpu: 0.0.40
codegen_flags: <defaults>
</compile_context>

<pallas_src>
import math
from functools import partial

import jax
import jax.numpy as jnp
from jax.experimental import pallas as pl
from jax.experimental.pallas import tpu as pltpu


def _round_up(v, m):
    return -(-v // m) * m


def _default_num_cores():
    # v7x has 2 TensorCores per chip; v5e/v6e have 1 (extra axis = pure overhead).
    try:
        kind = jax.devices()[0].device_kind.lower()
        if "v7" in kind:
            return 2
    except Exception:
        pass
    return 1


def _make_estep_kernel(K, L1, tb, n_inner, n_valid):
    """E-step kernel: per-frame responsibilities + sufficient statistics.

    Inputs  : xt (L1, tb) tile  (row L1-1 is all-ones), mu_aug (L1, K),
              prec_aug (L1, K) (ones/zeros in the augmented row),
              bias (1, K) with bias[k] = log w_k - 0.5*(L*log(2*pi) + log|Sigma_k|).
    Outputs : per-core ll (1,1), zpx (L1,K) = [px^T ; z], pxx (L1,K) = [pxx^T ; z].
    """

    def kernel(xt_ref, mut_ref, prect_ref, bias_ref,
               ll_ref, zpx_ref, pxx_ref,
               num_scr, acc_zpx, acc_pxx, acc_ll):
        i = pl.program_id(1)

        # Zero this core's scratch accumulators on the first inner step.
        @pl.when(i == 0)
        def _init():
            acc_zpx[...] = jnp.zeros_like(acc_zpx)
            acc_pxx[...] = jnp.zeros_like(acc_pxx)
            acc_ll[...] = jnp.zeros_like(acc_ll)

        xt = xt_ref[...]                  # (L1, tb) frames on lanes -> dense vregs
        bias = bias_ref[...]              # (1, K)

        # Lane-validity mask for zero-padded frames in the tail tiles.
        tile = pl.program_id(0) * n_inner + i
        lane = jax.lax.broadcasted_iota(jnp.int32, (1, tb), 1)
        valid = (tile * tb + lane) < n_valid                     # (1, tb)

        # Per-component log-score (direct-form Mahalanobis: VPU + sublane reduce),
        # written into a stacked (K, tb) scratch so the softmax below runs on
        # dense-sublane vregs and calls exp exactly once.
        for k in range(K):  # TODO(synk): block over K via fori_loop if K > 8
            mu_k = mut_ref[:, k:k + 1]    # (L1, 1); augmented row entry = 1
            pr_k = prect_ref[:, k:k + 1]  # (L1, 1); augmented row entry = 0
            diff = xt - mu_k
            mah = jnp.sum(diff * diff * pr_k, axis=0, keepdims=True)   # (1, tb)
            num_scr[k:k + 1, :] = bias[:, k:k + 1] - 0.5 * mah

        numer = num_scr[...]                                    # (K, tb)
        m = jnp.max(numer, axis=0, keepdims=True)               # (1, tb)
        p = jnp.exp(numer - m)                                   # one exp, (K, tb)
        s = jnp.sum(p, axis=0, keepdims=True)                    # (1, tb), >= 1
        post = jnp.where(valid, p * (1.0 / s), 0.0)              # (K, tb)
        denom = jnp.where(valid, m + jnp.log(s), 0.0)            # (1, tb)

        # Lane-vector log-likelihood accumulator (cross-lane reduce only at end).
        acc_ll[...] = acc_ll[...] + denom

        # Sufficient statistics on the MXU: contract the frame (tb) axis.
        #   [px^T ; z]  += x_aug   (L1, tb) . post^T (tb, K)
        #   [pxx^T; z]  += x_aug^2 (L1, tb) . post^T (tb, K)
        dn = (((1,), (1,)), ((), ()))
        acc_zpx[...] = acc_zpx[...] + jax.lax.dot_general(
            xt, post, dn, preferred_element_type=jnp.float32)
        x2 = xt * xt
        acc_pxx[...] = acc_pxx[...] + jax.lax.dot_general(
            x2, post, dn, preferred_element_type=jnp.float32)

        # Write the (tiny) output refs exactly once per core.
        @pl.when(i == n_inner - 1)
        def _finalize():
            ll_ref[...] = jnp.sum(acc_ll[...], axis=1, keepdims=True)   # (1, 1)
            zpx_ref[...] = acc_zpx[...]
            pxx_ref[...] = acc_pxx[...]

    return kernel


def _estep(xt_aug, w, mu, sigma_diag, *, B, tb, n_inner, num_cores):
    """One E-step over all frames.  Returns (log_likelihood, z, px, pxx)."""
    L1, _B_pad = xt_aug.shape
    L = L1 - 1
    K = w.shape[0]
    log_2pi = L * math.log(2.0 * math.pi)

    # Parameter-only math hoisted out of the kernel (computed once per E-step).
    logdet = jnp.sum(jnp.log(sigma_diag), axis=-1)                        # (K,)
    bias = (jnp.log(w) - 0.5 * (log_2pi + logdet)).reshape(1, K)
    mu_aug = jnp.concatenate(
        [mu.T, jnp.ones((1, K), jnp.float32)], axis=0)                    # (L1, K)
    prec_aug = jnp.concatenate(
        [(1.0 / sigma_diag).T, jnp.zeros((1, K), jnp.float32)], axis=0)   # (L1, K)

    kernel = _make_estep_kernel(K, L1, tb, n_inner, B)
    ll, zpx, pxx = pl.pallas_call(
        kernel,
        grid=(num_cores, n_inner),
        in_specs=[
            pl.BlockSpec((L1, tb), lambda c, i: (0, c * n_inner + i)),  # x_aug tile
            pl.BlockSpec((L1, K), lambda c, i: (0, 0)),                 # mu_aug
            pl.BlockSpec((L1, K), lambda c, i: (0, 0)),                 # prec_aug
            pl.BlockSpec((1, K), lambda c, i: (0, 0)),                  # bias
        ],
        out_specs=[
            pl.BlockSpec((None, 1, 1), lambda c, i: (c, 0, 0)),         # ll per core
            pl.BlockSpec((None, L1, K), lambda c, i: (c, 0, 0)),        # [px^T; z]
            pl.BlockSpec((None, L1, K), lambda c, i: (c, 0, 0)),        # [pxx^T; z]
        ],
        out_shape=(
            jax.ShapeDtypeStruct((num_cores, 1, 1), jnp.float32),
            jax.ShapeDtypeStruct((num_cores, L1, K), jnp.float32),
            jax.ShapeDtypeStruct((num_cores, L1, K), jnp.float32),
        ),
        scratch_shapes=[
            pltpu.VMEM((K, tb), jnp.float32),    # stacked scores (K, tb)
            pltpu.VMEM((L1, K), jnp.float32),    # acc [px^T; z]
            pltpu.VMEM((L1, K), jnp.float32),    # acc [pxx^T; z]
            pltpu.VMEM((1, tb), jnp.float32),    # acc log-likelihood lanes
        ],
        compiler_params=pltpu.CompilerParams(
            dimension_semantics=("parallel", "arbitrary")),
    )(xt_aug, mu_aug.astype(jnp.float32), prec_aug.astype(jnp.float32),
      bias.astype(jnp.float32))

    log_likelihood = jnp.sum(ll)
    zpx = jnp.sum(zpx, axis=0)           # (L1, K)
    pxx = jnp.sum(pxx, axis=0)           # (L1, K)
    z = zpx[L]                           # (K,)
    px = zpx[:L].T                       # (K, L)
    pxx = pxx[:L].T                      # (K, L)
    return log_likelihood, z, px, pxx


@partial(jax.jit, static_argnames=("B", "n_iter", "eps", "weight_floor",
                                   "var_floor", "tb", "n_inner", "num_cores"))
def _train(xt_aug, w0, mu0, sigma0, *, B, n_iter, eps, weight_floor,
           var_floor, tb, n_inner, num_cores):
    """Full EM loop on-device (lax.while_loop with torch-style convergence test)."""
    K, L = mu0.shape

    def body(state):
        n, prev_ll, w, mu, sigma_diag, _done = state

        # ---- E-step (Pallas kernel) ----
        ll, z, px, pxx = _estep(xt_aug, w, mu, sigma_diag,
                                B=B, tb=tb, n_inner=n_inner, num_cores=num_cores)

        # ---- M-step (alpha == 0, diag covariance; matches the torch code) ----
        w_new = z / B
        # NOTE: the reference torch code would produce inf/NaN for an empty
        # component; this guard keeps it finite (behavioral difference only then).
        zinv = 1.0 / jnp.maximum(z, 1e-30)
        w_new = jnp.maximum(w_new, weight_floor)
        sum_floor = weight_floor * K
        a = (1.0 - sum_floor) / (jnp.sum(w_new) - sum_floor)
        b = weight_floor * (1.0 - a)
        w_new = a * w_new + b

        mu_new = px * zinv[:, None]
        sig_new = pxx * zinv[:, None] - mu_new ** 2
        sig_new = jnp.maximum(sig_new, var_floor)

        # torch: `if n and change < eps: break` (break AFTER this iteration's update)
        change = ll - prev_ll
        done = (n >= 1) & (change < eps)
        return n + 1, ll, w_new, mu_new, sig_new, done

    def cond(state):
        n, _ll, _w, _mu, _sig, done = state
        return (n < n_iter) & jnp.logical_not(done)

    state0 = (jnp.int32(0), jnp.float32(-jnp.inf), w0, mu0, sigma0,
              jnp.bool_(False))
    _n, ll, w, mu, sigma_diag, _done = jax.lax.while_loop(cond, body, state0)
    return w, mu, sigma_diag, ll


def gaussian_mixture_modeling(x, order, n_mixture, *, n_iter=100, eps=1e-5,
                              weight_floor=1e-5, var_floor=1e-6,
                              init_key=None, tb=8192, num_cores=None):
    """Train a diag-covariance GMM with EM.  Mirrors GaussianMixtureModeling.forward."""
    L = order + 1
    assert x.shape[-1] == L, "dimension of input"
    x = jnp.asarray(x, jnp.float32).reshape(-1, L)
    B = x.shape[0]
    K = n_mixture

    # Deterministic parameter init (matches __init__: w=1/K, mu=randn, sigma=eye).
    if init_key is None:
        init_key = jax.random.PRNGKey(0)
    w0 = jnp.ones((K,), jnp.float32) / K
    mu0 = jax.random.normal(init_key, (K, L), jnp.float32)
    sigma0 = jnp.ones((K, L), jnp.float32)       # diagonal of eye(L)

    if num_cores is None:
        num_cores = _default_num_cores()
    num_cores = max(1, int(num_cores))

    # Pad frames so every core gets an integer number of lane-aligned tiles.
    per_core = _round_up(max(1, -(-B // num_cores)), 128)
    tb_eff = max(128, min(_round_up(int(tb), 128), per_core))
    n_inner = _round_up(per_core, tb_eff) // tb_eff
    B_pad = num_cores * n_inner * tb_eff
    x_pad = jnp.pad(x, ((0, B_pad - B), (0, 0)))
    # (L+1, B_pad): frames on lanes; a final all-ones row makes z fall out of the
    # same MXU contraction as px (padded columns are masked out in-kernel).
    xt_aug = jnp.concatenate(
        [x_pad.T, jnp.ones((1, B_pad), jnp.float32)], axis=0)

    w, mu, sigma_diag, log_likelihood = _train(
        xt_aug, w0, mu0, sigma0, B=B, n_iter=int(n_iter), eps=float(eps),
        weight_floor=float(weight_floor), var_floor=float(var_floor),
        tb=tb_eff, n_inner=n_inner, num_cores=num_cores)

    sigma = sigma_diag[:, None, :] * jnp.eye(L, dtype=jnp.float32)[None, :, :]
    params = [w, mu, sigma]
    return params, log_likelihood


if __name__ == "__main__":
    order = 7          # L = order + 1 = 8
    n_mixture = 4      # K
    key = jax.random.PRNGKey(0)
    k_data, k_init = jax.random.split(key)

    # x : (..., M+1) — small deterministic input, flattened internally to (64, 8).
    x = jax.random.normal(k_data, (8, 8, order + 1), jnp.float32)

    params, log_likelihood = gaussian_mixture_modeling(
        x, order, n_mixture, n_iter=10, eps=1e-5, init_key=k_init)

    w, mu, sigma = params
    jax.block_until_ready((w, mu, sigma, log_likelihood))
    assert w.shape == (n_mixture,)
    assert mu.shape == (n_mixture, order + 1)
    assert sigma.shape == (n_mixture, order + 1, order + 1)
    assert jnp.isfinite(log_likelihood)
    assert bool(jnp.all(jnp.isfinite(mu))) and bool(jnp.all(jnp.isfinite(sigma)))
    assert abs(float(jnp.sum(w)) - 1.0) < 1e-3
    print("KERNEL_OK")
</pallas_src>

<mosaic_0001>
module attributes {stable_mosaic.version = 11 : i64} {
  func.func @kernel(%arg0: i32, %arg1: i32, %arg2: memref<9x128xf32, #tpu.memory_space<vmem>>, %arg3: memref<9x4xf32, #tpu.memory_space<vmem>>, %arg4: memref<9x4xf32, #tpu.memory_space<vmem>>, %arg5: memref<1x4xf32, #tpu.memory_space<vmem>>, %arg6: memref<1x1x1xf32, #tpu.memory_space<vmem>>, %arg7: memref<1x9x4xf32, #tpu.memory_space<vmem>>, %arg8: memref<1x9x4xf32, #tpu.memory_space<vmem>>, %arg9: memref<4x128xf32, #tpu.memory_space<vmem>>, %arg10: memref<9x4xf32, #tpu.memory_space<vmem>>, %arg11: memref<9x4xf32, #tpu.memory_space<vmem>>, %arg12: memref<1x128xf32, #tpu.memory_space<vmem>>) attributes {dimension_semantics = [#tpu.dimension_semantics<parallel>, #tpu.dimension_semantics<arbitrary>], iteration_bounds = array<i64: 1, 1>, scalar_prefetch = 0 : i64, scratch_operands = 4 : i64, tpu.core_type = #tpu.core_type<tc>, window_params = [{transform_indices = @transform_0, window_bounds = array<i64: 9, 128>}, {pipeline_mode = #tpu.pipeline_mode<synchronous>, transform_indices = @transform_1, window_bounds = array<i64: 9, 4>}, {pipeline_mode = #tpu.pipeline_mode<synchronous>, transform_indices = @transform_2, window_bounds = array<i64: 9, 4>}, {pipeline_mode = #tpu.pipeline_mode<synchronous>, transform_indices = @transform_3, window_bounds = array<i64: 1, 4>}, {transform_indices = @transform_4, window_bounds = array<i64: 1, 1, 1>}, {transform_indices = @transform_5, window_bounds = array<i64: 1, 9, 4>}, {transform_indices = @transform_6, window_bounds = array<i64: 1, 9, 4>}]} {
    %c0_i32 = arith.constant 0 : i32
    %0 = arith.cmpi eq, %arg1, %c0_i32 : i32
    %1 = arith.extui %0 : i1 to i32
    %c0_i32_0 = arith.constant 0 : i32
    %2 = arith.cmpi ne, %1, %c0_i32_0 : i32
    scf.if %2 {
      %cst_55 = arith.constant 0.000000e+00 : f32
      %108 = vector.broadcast %cst_55 : f32 to vector<9x4xf32>
      %c0_56 = arith.constant 0 : index
      %c0_57 = arith.constant 0 : index
      %109 = vector.load %arg10[%c0_56, %c0_57] : memref<9x4xf32, #tpu.memory_space<vmem>>, vector<9x4xf32>
      tpu.vector_store %arg10[%c0_56, %c0_57], %108 {strides = array<i32>} : memref<9x4xf32, #tpu.memory_space<vmem>>, vector<9x4xf32>,
      %cst_58 = arith.constant 0.000000e+00 : f32
      %110 = vector.broadcast %cst_58 : f32 to vector<9x4xf32>
      %c0_59 = arith.constant 0 : index
      %c0_60 = arith.constant 0 : index
      %111 = vector.load %arg11[%c0_59, %c0_60] : memref<9x4xf32, #tpu.memory_space<vmem>>, vector<9x4xf32>
      tpu.vector_store %arg11[%c0_59, %c0_60], %110 {strides = array<i32>} : memref<9x4xf32, #tpu.memory_space<vmem>>, vector<9x4xf32>,
      %cst_61 = arith.constant 0.000000e+00 : f32
      %112 = vector.broadcast %cst_61 : f32 to vector<1x128xf32>
      %c0_62 = arith.constant 0 : index
      %c0_63 = arith.constant 0 : index
      %113 = vector.load %arg12[%c0_62, %c0_63] : memref<1x128xf32, #tpu.memory_space<vmem>>, vector<1x128xf32>
      tpu.vector_store %arg12[%c0_62, %c0_63], %112 {strides = array<i32>} : memref<1x128xf32, #tpu.memory_space<vmem>>, vector<1x128xf32>,
    } else {
    }
    %c0 = arith.constant 0 : index
    %c0_1 = arith.constant 0 : index
    %3 = vector.load %arg2[%c0, %c0_1] : memref<9x128xf32, #tpu.memory_space<vmem>>, vector<9x128xf32>
    %c0_2 = arith.constant 0 : index
    %c0_3 = arith.constant 0 : index
    %4 = vector.load %arg5[%c0_2, %c0_3] : memref<1x4xf32, #tpu.memory_space<vmem>>, vector<1x4xf32>
    %c1_i32 = arith.constant 1 : i32
    %5 = arith.muli %arg0, %c1_i32 : i32
    %6 = arith.addi %5, %arg1 : i32
    %7 = tpu.iota {dimensions = array<i32: 1>} : vector<1x128xi32>
    %c128_i32 = arith.constant 128 : i32
    %8 = arith.muli %6, %c128_i32 : i32
    %9 = vector.broadcast %8 : i32 to vector<1x128xi32>
    %10 = arith.addi %9, %7 : vector<1x128xi32>
    %c64_i32 = arith.constant 64 : i32
    %11 = vector.broadcast %c64_i32 : i32 to vector<1x128xi32>
    %12 = arith.cmpi slt, %10, %11 : vector<1x128xi32>
    %c0_4 = arith.constant 0 : index
    %c0_5 = arith.constant 0 : index
    %13 = vector.load %arg3[%c0_4, %c0_5] : memref<9x4xf32, #tpu.memory_space<vmem>>, vector<9x1xf32>
    %c0_6 = arith.constant 0 : index
    %c0_7 = arith.constant 0 : index
    %14 = vector.load %arg4[%c0_6, %c0_7] : memref<9x4xf32, #tpu.memory_space<vmem>>, vector<9x1xf32>
    %15 = vector.broadcast %13 : vector<9x1xf32> to vector<9x128xf32>
    %16 = arith.subf %3, %15 : vector<9x128xf32>
    %17 = arith.mulf %16, %16 : vector<9x128xf32>
    %18 = vector.broadcast %14 : vector<9x1xf32> to vector<9x128xf32>
    %19 = arith.mulf %17, %18 : vector<9x128xf32>
    %cst = arith.constant dense<0.000000e+00> : vector<128xf32>
    %20 = vector.multi_reduction <add>, %19, %cst [0] : vector<9x128xf32> to vector<128xf32>
    %21 = vector.shape_cast %20 : vector<128xf32> to vector<1x128xf32>
    %22 = vector.extract_strided_slice %4 {offsets = [0, 0], sizes = [1, 1], strides = [1, 1]} : vector<1x4xf32> to vector<1x1xf32>
    %cst_8 = arith.constant 5.000000e-01 : f32
    %23 = vector.broadcast %cst_8 : f32 to vector<1x128xf32>
    %24 = arith.mulf %23, %21 : vector<1x128xf32>
    %25 = vector.broadcast %22 : vector<1x1xf32> to vector<1x128xf32>
    %26 = arith.subf %25, %24 : vector<1x128xf32>
    %c0_9 = arith.constant 0 : index
    %c0_10 = arith.constant 0 : index
    %27 = vector.load %arg9[%c0_9, %c0_10] : memref<4x128xf32, #tpu.memory_space<vmem>>, vector<1x128xf32>
    tpu.vector_store %arg9[%c0_9, %c0_10], %26 {strides = array<i32>} : memref<4x128xf32, #tpu.memory_space<vmem>>, vector<1x128xf32>,
    %c0_11 = arith.constant 0 : index
    %c1 = arith.constant 1 : index
    %28 = vector.load %arg3[%c0_11, %c1] : memref<9x4xf32, #tpu.memory_space<vmem>>, vector<9x1xf32>
    %c0_12 = arith.constant 0 : index
    %c1_13 = arith.constant 1 : index
    %29 = vector.load %arg4[%c0_12, %c1_13] : memref<9x4xf32, #tpu.memory_space<vmem>>, vector<9x1xf32>
    %30 = vector.broadcast %28 : vector<9x1xf32> to vector<9x128xf32>
    %31 = arith.subf %3, %30 : vector<9x128xf32>
    %32 = arith.mulf %31, %31 : vector<9x128xf32>
    %33 = vector.broadcast %29 : vector<9x1xf32> to vector<9x128xf32>
    %34 = arith.mulf %32, %33 : vector<9x128xf32>
    %cst_14 = arith.constant dense<0.000000e+00> : vector<128xf32>
    %35 = vector.multi_reduction <add>, %34, %cst_14 [0] : vector<9x128xf32> to vector<128xf32>
    %36 = vector.shape_cast %35 : vector<128xf32> to vector<1x128xf32>
    %37 = vector.extract_strided_slice %4 {offsets = [0, 1], sizes = [1, 1], strides = [1, 1]} : vector<1x4xf32> to vector<1x1xf32>
    %cst_15 = arith.constant 5.000000e-01 : f32
    %38 = vector.broadcast %cst_15 : f32 to vector<1x128xf32>
    %39 = arith.mulf %38, %36 : vector<1x128xf32>
    %40 = vector.broadcast %37 : vector<1x1xf32> to vector<1x128xf32>
    %41 = arith.subf %40, %39 : vector<1x128xf32>
    %c1_16 = arith.constant 1 : index
    %c0_17 = arith.constant 0 : index
    %42 = vector.load %arg9[%c1_16, %c0_17] : memref<4x128xf32, #tpu.memory_space<vmem>>, vector<1x128xf32>
    tpu.vector_store %arg9[%c1_16, %c0_17], %41 {strides = array<i32>} : memref<4x128xf32, #tpu.memory_space<vmem>>, vector<1x128xf32>,
    %c0_18 = arith.constant 0 : index
    %c2 = arith.constant 2 : index
    %43 = vector.load %arg3[%c0_18, %c2] : memref<9x4xf32, #tpu.memory_space<vmem>>, vector<9x1xf32>
    %c0_19 = arith.constant 0 : index
    %c2_20 = arith.constant 2 : index
    %44 = vector.load %arg4[%c0_19, %c2_20] : memref<9x4xf32, #tpu.memory_space<vmem>>, vector<9x1xf32>
    %45 = vector.broadcast %43 : vector<9x1xf32> to vector<9x128xf32>
    %46 = arith.subf %3, %45 : vector<9x128xf32>
    %47 = arith.mulf %46, %46 : vector<9x128xf32>
    %48 = vector.broadcast %44 : vector<9x1xf32> to vector<9x128xf32>
    %49 = arith.mulf %47, %48 : vector<9x128xf32>
    %cst_21 = arith.constant dense<0.000000e+00> : vector<128xf32>
    %50 = vector.multi_reduction <add>, %49, %cst_21 [0] : vector<9x128xf32> to vector<128xf32>
    %51 = vector.shape_cast %50 : vector<128xf32> to vector<1x128xf32>
    %52 = vector.extract_strided_slice %4 {offsets = [0, 2], sizes = [1, 1], strides = [1, 1]} : vector<1x4xf32> to vector<1x1xf32>
    %cst_22 = arith.constant 5.000000e-01 : f32
    %53 = vector.broadcast %cst_22 : f32 to vector<1x128xf32>
    %54 = arith.mulf %53, %51 : vector<1x128xf32>
    %55 = vector.broadcast %52 : vector<1x1xf32> to vector<1x128xf32>
    %56 = arith.subf %55, %54 : vector<1x128xf32>
    %c2_23 = arith.constant 2 : index
    %c0_24 = arith.constant 0 : index
    %57 = vector.load %arg9[%c2_23, %c0_24] : memref<4x128xf32, #tpu.memory_space<vmem>>, vector<1x128xf32>
    tpu.vector_store %arg9[%c2_23, %c0_24], %56 {strides = array<i32>} : memref<4x128xf32, #tpu.memory_space<vmem>>, vector<1x128xf32>,
    %c0_25 = arith.constant 0 : index
    %c3 = arith.constant 3 : index
    %58 = vector.load %arg3[%c0_25, %c3] : memref<9x4xf32, #tpu.memory_space<vmem>>, vector<9x1xf32>
    %c0_26 = arith.constant 0 : index
    %c3_27 = arith.constant 3 : index
    %59 = vector.load %arg4[%c0_26, %c3_27] : memref<9x4xf32, #tpu.memory_space<vmem>>, vector<9x1xf32>
    %60 = vector.broadcast %58 : vector<9x1xf32> to vector<9x128xf32>
    %61 = arith.subf %3, %60 : vector<9x128xf32>
    %62 = arith.mulf %61, %61 : vector<9x128xf32>
    %63 = vector.broadcast %59 : vector<9x1xf32> to vector<9x128xf32>
    %64 = arith.mulf %62, %63 : vector<9x128xf32>
    %cst_28 = arith.constant dense<0.000000e+00> : vector<128xf32>
    %65 = vector.multi_reduction <add>, %64, %cst_28 [0] : vector<9x128xf32> to vector<128xf32>
    %66 = vector.shape_cast %65 : vector<128xf32> to vector<1x128xf32>
    %67 = vector.extract_strided_slice %4 {offsets = [0, 3], sizes = [1, 1], strides = [1, 1]} : vector<1x4xf32> to vector<1x1xf32>
    %cst_29 = arith.constant 5.000000e-01 : f32
    %68 = vector.broadcast %cst_29 : f32 to vector<1x128xf32>
    %69 = arith.mulf %68, %66 : vector<1x128xf32>
    %70 = vector.broadcast %67 : vector<1x1xf32> to vector<1x128xf32>
    %71 = arith.subf %70, %69 : vector<1x128xf32>
    %c3_30 = arith.constant 3 : index
    %c0_31 = arith.constant 0 : index
    %72 = vector.load %arg9[%c3_30, %c0_31] : memref<4x128xf32, #tpu.memory_space<vmem>>, vector<1x128xf32>
    tpu.vector_store %arg9[%c3_30, %c0_31], %71 {strides = array<i32>} : memref<4x128xf32, #tpu.memory_space<vmem>>, vector<1x128xf32>,
    %c0_32 = arith.constant 0 : index
    %c0_33 = arith.constant 0 : index
    %73 = vector.load %arg9[%c0_32, %c0_33] : memref<4x128xf32, #tpu.memory_space<vmem>>, vector<4x128xf32>
    %cst_34 = arith.constant dense<0xFF800000> : vector<128xf32>
    %74 = vector.multi_reduction <maximumf>, %73, %cst_34 [0] : vector<4x128xf32> to vector<128xf32>
    %75 = vector.shape_cast %74 : vector<128xf32> to vector<1x128xf32>
    %76 = vector.broadcast %75 : vector<1x128xf32> to vector<4x128xf32>
    %77 = arith.subf %73, %76 : vector<4x128xf32>
    %78 = math.exp %77 : vector<4x128xf32>
    %cst_35 = arith.constant dense<0.000000e+00> : vector<128xf32>
    %79 = vector.multi_reduction <add>, %78, %cst_35 [0] : vector<4x128xf32> to vector<128xf32>
    %80 = vector.shape_cast %79 : vector<128xf32> to vector<1x128xf32>
    %cst_36 = arith.constant 1.000000e+00 : f32
    %81 = vector.broadcast %cst_36 : f32 to vector<1x128xf32>
    %82 = arith.divf %81, %80 : vector<1x128xf32>
    %83 = vector.broadcast %82 : vector<1x128xf32> to vector<4x128xf32>
    %84 = arith.mulf %78, %83 : vector<4x128xf32>
    %cst_37 = arith.constant 0.000000e+00 : f32
    %85 = vector.shape_cast %12 : vector<1x128xi1> to vector<1x128xi1>
    %86 = vector.broadcast %85 : vector<1x128xi1> to vector<4x128xi1>
    %87 = vector.broadcast %cst_37 : f32 to vector<4x128xf32>
    %88 = arith.select %86, %84, %87 : vector<4x128xi1>, vector<4x128xf32>
    %89 = math.log %80 : vector<1x128xf32>
    %90 = arith.addf %75, %89 : vector<1x128xf32>
    %cst_38 = arith.constant 0.000000e+00 : f32
    %91 = vector.broadcast %cst_38 : f32 to vector<1x128xf32>
    %92 = arith.select %12, %90, %91 : vector<1x128xi1>, vector<1x128xf32>
    %c0_39 = arith.constant 0 : index
    %c0_40 = arith.constant 0 : index
    %93 = vector.load %arg12[%c0_39, %c0_40] : memref<1x128xf32, #tpu.memory_space<vmem>>, vector<1x128xf32>
    %94 = arith.addf %93, %92 : vector<1x128xf32>
    %c0_41 = arith.constant 0 : index
    %c0_42 = arith.constant 0 : index
    %95 = vector.load %arg12[%c0_41, %c0_42] : memref<1x128xf32, #tpu.memory_space<vmem>>, vector<1x128xf32>
    tpu.vector_store %arg12[%c0_41, %c0_42], %94 {strides = array<i32>} : memref<1x128xf32, #tpu.memory_space<vmem>>, vector<1x128xf32>,
    %c0_43 = arith.constant 0 : index
    %c0_44 = arith.constant 0 : index
    %96 = vector.load %arg10[%c0_43, %c0_44] : memref<9x4xf32, #tpu.memory_space<vmem>>, vector<9x4xf32>
    %cst_45 = arith.constant dense<0.000000e+00> : vector<9x4xf32>
    %97 = tpu.matmul %3, %88, %cst_45 {dimension_numbers = #tpu.dot_dimension_numbers<[1], [1], [0], [0], [0, 0, 1, 0], [], []>} : vector<9x128xf32>, vector<4x128xf32>, vector<9x4xf32> -> vector<9x4xf32>
    %98 = arith.addf %96, %97 : vector<9x4xf32>
    %c0_46 = arith.constant 0 : index
    %c0_47 = arith.constant 0 : index
    %99 = vector.load %arg10[%c0_46, %c0_47] : memref<9x4xf32, #tpu.memory_space<vmem>>, vector<9x4xf32>
    tpu.vector_store %arg10[%c0_46, %c0_47], %98 {strides = array<i32>} : memref<9x4xf32, #tpu.memory_space<vmem>>, vector<9x4xf32>,
    %100 = arith.mulf %3, %3 : vector<9x128xf32>
    %c0_48 = arith.constant 0 : index
    %c0_49 = arith.constant 0 : index
    %101 = vector.load %arg11[%c0_48, %c0_49] : memref<9x4xf32, #tpu.memory_space<vmem>>, vector<9x4xf32>
    %cst_50 = arith.constant dense<0.000000e+00> : vector<9x4xf32>
    %102 = tpu.matmul %100, %88, %cst_50 {dimension_numbers = #tpu.dot_dimension_numbers<[1], [1], [0], [0], [0, 0, 1, 0], [], []>} : vector<9x128xf32>, vector<4x128xf32>, vector<9x4xf32> -> vector<9x4xf32>
    %103 = arith.addf %101, %102 : vector<9x4xf32>
    %c0_51 = arith.constant 0 : index
    %c0_52 = arith.constant 0 : index
    %104 = vector.load %arg11[%c0_51, %c0_52] : memref<9x4xf32, #tpu.memory_space<vmem>>, vector<9x4xf32>
    tpu.vector_store %arg11[%c0_51, %c0_52], %103 {strides = array<i32>} : memref<9x4xf32, #tpu.memory_space<vmem>>, vector<9x4xf32>,
    %c0_i32_53 = arith.constant 0 : i32
    %105 = arith.cmpi eq, %arg1, %c0_i32_53 : i32
    %106 = arith.extui %105 : i1 to i32
    %c0_i32_54 = arith.constant 0 : i32
    %107 = arith.cmpi ne, %106, %c0_i32_54 : i32
    scf.if %107 {
      %c0_55 = arith.constant 0 : index
      %c0_56 = arith.constant 0 : index
      %108 = vector.load %arg12[%c0_55, %c0_56] : memref<1x128xf32, #tpu.memory_space<vmem>>, vector<1x128xf32>
      %cst_57 = arith.constant dense<0.000000e+00> : vector<1xf32>
      %109 = vector.multi_reduction <add>, %108, %cst_57 [1] : vector<1x128xf32> to vector<1xf32>
      %110 = vector.shape_cast %109 : vector<1xf32> to vector<1x1xf32>
      %c0_58 = arith.constant 0 : index
      %c0_59 = arith.constant 0 : index
      %c0_60 = arith.constant 0 : index
      %111 = vector.load %arg6[%c0_58, %c0_59, %c0_60] : memref<1x1x1xf32, #tpu.memory_space<vmem>>, vector<1x1x1xf32>
      %112 = vector.shape_cast %111 : vector<1x1x1xf32> to vector<1x1xf32>
      %113 = vector.shape_cast %110 : vector<1x1xf32> to vector<1x1x1xf32>
      tpu.vector_store %arg6[%c0_58, %c0_59, %c0_60], %113 {strides = array<i32>} : memref<1x1x1xf32, #tpu.memory_space<vmem>>, vector<1x1x1xf32>,
      %c0_61 = arith.constant 0 : index
      %c0_62 = arith.constant 0 : index
      %114 = vector.load %arg10[%c0_61, %c0_62] : memref<9x4xf32, #tpu.memory_space<vmem>>, vector<9x4xf32>
      %c0_63 = arith.constant 0 : index
      %c0_64 = arith.constant 0 : index
      %c0_65 = arith.constant 0 : index
      %115 = vector.load %arg7[%c0_63, %c0_64, %c0_65] : memref<1x9x4xf32, #tpu.memory_space<vmem>>, vector<1x9x4xf32>
      %116 = vector.shape_cast %115 : vector<1x9x4xf32> to vector<9x4xf32>
      %117 = vector.shape_cast %114 : vector<9x4xf32> to vector<1x9x4xf32>
      tpu.vector_store %arg7[%c0_63, %c0_64, %c0_65], %117 {strides = array<i32>} : memref<1x9x4xf32, #tpu.memory_space<vmem>>, vector<1x9x4xf32>,
      %c0_66 = arith.constant 0 : index
      %c0_67 = arith.constant 0 : index
      %118 = vector.load %arg11[%c0_66, %c0_67] : memref<9x4xf32, #tpu.memory_space<vmem>>, vector<9x4xf32>
      %c0_68 = arith.constant 0 : index
      %c0_69 = arith.constant 0 : index
      %c0_70 = arith.constant 0 : index
      %119 = vector.load %arg8[%c0_68, %c0_69, %c0_70] : memref<1x9x4xf32, #tpu.memory_space<vmem>>, vector<1x9x4xf32>
      %120 = vector.shape_cast %119 : vector<1x9x4xf32> to vector<9x4xf32>
      %121 = vector.shape_cast %118 : vector<9x4xf32> to vector<1x9x4xf32>
      tpu.vector_store %arg8[%c0_68, %c0_69, %c0_70], %121 {strides = array<i32>} : memref<1x9x4xf32, #tpu.memory_space<vmem>>, vector<1x9x4xf32>,
    } else {
    }
    return
  }
  func.func @transform_0(%arg0: i32, %arg1: i32) -> (i32, i32) {
    %c1_i32 = arith.constant 1 : i32
    %0 = arith.muli %arg0, %c1_i32 : i32
    %1 = arith.addi %0, %arg1 : i32
    %c0_i32 = arith.constant 0 : i32
    %c0_i32_0 = arith.constant 0 : i32
    return %c0_i32, %1 : i32, i32
  }
  func.func @transform_1(%arg0: i32, %arg1: i32) -> (i32, i32) {
    %c0_i32 = arith.constant 0 : i32
    %c0_i32_0 = arith.constant 0 : i32
    %c0_i32_1 = arith.constant 0 : i32
    return %c0_i32, %c0_i32_0 : i32, i32
  }
  func.func @transform_2(%arg0: i32, %arg1: i32) -> (i32, i32) {
    %c0_i32 = arith.constant 0 : i32
    %c0_i32_0 = arith.constant 0 : i32
    %c0_i32_1 = arith.constant 0 : i32
    return %c0_i32, %c0_i32_0 : i32, i32
  }
  func.func @transform_3(%arg0: i32, %arg1: i32) -> (i32, i32) {
    %c0_i32 = arith.constant 0 : i32
    %c0_i32_0 = arith.constant 0 : i32
    %c0_i32_1 = arith.constant 0 : i32
    return %c0_i32, %c0_i32_0 : i32, i32
  }
  func.func @transform_4(%arg0: i32, %arg1: i32) -> (i32, i32, i32) {
    %c0_i32 = arith.constant 0 : i32
    %c0_i32_0 = arith.constant 0 : i32
    %c0_i32_1 = arith.constant 0 : i32
    return %arg0, %c0_i32, %c0_i32_0 : i32, i32, i32
  }
  func.func @transform_5(%arg0: i32, %arg1: i32) -> (i32, i32, i32) {
    %c0_i32 = arith.constant 0 : i32
    %c0_i32_0 = arith.constant 0 : i32
    %c0_i32_1 = arith.constant 0 : i32
    return %arg0, %c0_i32, %c0_i32_0 : i32, i32, i32
  }
  func.func @transform_6(%arg0: i32, %arg1: i32) -> (i32, i32, i32) {
    %c0_i32 = arith.constant 0 : i32
    %c0_i32_0 = arith.constant 0 : i32
    %c0_i32_1 = arith.constant 0 : i32
    return %arg0, %c0_i32, %c0_i32_0 : i32, i32, i32
  }
}

</mosaic_0001>

<bundles_post_ra>
// kernel: body.6
= control target key start
LH: loop header
LB: loop body
LE: loop exit
PB: predicated region body
PF: predicated region fallthrough
CT: control target
= control target key end

     0   :  { %v570_v2 = vmov 2   ;;  %v571_v3 = vmov 0   ;;  %s707_s0 = inlined_call_operand.vmem [shape: f32[9,128], index: 0, kind: input, shape index: {}]   ;;  %s708_s1 = inlined_call_operand.vmem [shape: f32[9,4], index: 1, kind: input, shape index: {}]   ;;  %s709_s2 = inlined_call_operand.vmem [shape: f32[9,4], index: 2, kind: input, shape index: {}]   ;;  %s710_s3 = inlined_call_operand.vmem [shape: f32[1,4], index: 3, kind: input, shape index: {}]   ;;  %s711_s4 = inlined_call_operand.hbm [shape: f32[1,1,1], index: 4, kind: output, shape index: {0}]   ;;  %s712_s5 = inlined_call_operand.vmem [shape: f32[1,9,4], index: 5, kind: output, shape index: {1}]   ;;  %s713_s6 = inlined_call_operand.vmem [shape: f32[1,9,4], index: 6, kind: output, shape index: {2}]  }
   0x1   :  { %v160_v0 = vld [vmem:[%s708_s1 + $0x8] sm:$0x1]  ;;  %525 = vset.pattern.permute.xlu1 %v570_v2  ;;  %524 = vset.pattern.permute.xlu0 %v571_v3  ;;  %v208_v5 = vld [vmem:[%s708_s1] sm:$0xff] }
   0x2   :  { %v60_v1 = vld [vmem:[%s708_s1 + $0x8] sm:$0x1]  ;;  %170 = vperm.xlu1 %525, %v160_v0  }
   0x3   :  { %70 = vperm.xlu0 %524, %v60_v1   ;;  %v209_v4 = vld [vmem:[%s708_s1 + $0x8] sm:$0x1] }
   0x4   :  { %12 = vsyncpa [#allocation7], 0  ;;  %v572_v6 = vmov 3   ;;  %v626_v7 = vld [vmem:[%s707_s0] sm:$0xff]  ;;  %v162_v8 = vld [vmem:[%s709_s2 + $0x8] sm:$0x1]  ;;  %v53_v57 = vlaneseq }
   0x5   :  { %510 = vmatprep.mubr.f32.mxu0 %v626_v7  ;;  %v111_v9 = vld [vmem:[%s708_s1 + $0x8] sm:$0x1]  ;;  %v573_v10 = vmov 1   ;;  %v112_v12 = vld [vmem:[%s709_s2] sm:$0xff]  ;;  %v574_v16 = vmov 0.0   ;;  %v372_v21 = vmul.f32 %v626_v7, %v626_v7  ;;  %vm89_vm0 = vcmask 1040384  }
   0x6   :  { %526 = vset.pattern.permute.xlu1 %v572_v6  ;;  %v62_v11 = vld [vmem:[%s709_s2 + $0x8] sm:$0x1]  ;;  %v51_v14 = vld [vmem:[%s710_s3] sm:$0x1]  ;;  %48 = vst [vmem:[#allocation5] sm:$0x1] %v574_v16 }
   0x7   :  { %529 = vset.pattern.permute.xlu0 %v572_v6  ;;  %219 = vperm.xlu1 %526, %v209_v4   ;;  %v113_v13 = vld [vmem:[%s709_s2 + $0x8] sm:$0x1]  ;;  %vm258_vm1 = vcmask 1043456   ;;  %vm44_vm3 = vcmask 24576   ;;  %vm42_vm4 = vcmask 31744   ;;  %vm462_vm5 = vcmask 0  }
   0x8   :  { %214 = vperm.xlu0 %529, %v208_v5   ;;  %v211_v15 = vld [vmem:[%s709_s2 + $0x8] sm:$0x1]  ;;  %515 = vmatprep.mubr.f32.mxu1 %v372_v21  ;;  %45 = vst.msk [vmem:[#allocation3 + $0x8] sm:$0x1] %vm44_vm3, %v574_v16  ;;  %47 = vst.msk [vmem:[#allocation4 + $0x8] sm:$0x1] %vm44_vm3, %v574_v16 }
   0x9   :  { %v656_v26 = vld [vmem:[%s707_s0 + $0x8] sm:$0x1]  ;;  %43 = vst.msk [vmem:[#allocation3] sm:$0xff] %vm42_vm4, %v574_v16  ;;  %46 = vst.msk [vmem:[#allocation4] sm:$0xff] %vm42_vm4, %v574_v16  ;;  %s575_s0 = smov [#allocation6]  }
   0xa   :  { %s478_s20 = sshll.u32 %s575_s0, 4  ;;  %s479_s20 = int_to_ptr.vmem [resolvable:$true] %s478_s20 }
   0xb   :  { %527 = vset.pattern.permute.xlu1 %v571_v3  ;;  %s548_s21 = scalar_lea.vmem %s479_s20, 16  ;;  %s552_s22 = scalar_lea.vmem %s479_s20, 32 }
   0xc   :  { %532 = vset.pattern.permute.xlu0 %v570_v2  ;;  %65 = vperm.xlu1 %527, %v208_v5   ;;  %p549_p0 = scmp.ne.s32.totalorder %s479_s20, %s548_s21  ;;  %p553_p1 = scmp.lt.s32.totalorder %s479_s20, %s479_s20 }
   0xd   :  { %184 = vperm.xlu0 %532, %v162_v8   ;;  %p554_p2 = scmp.lt.s32.totalorder %s552_s22, %s548_s21 }
   0xf   :  { %p555_p3 = por %p554_p2, %p553_p1 }
  0x10   :  { %528 = vset.pattern.permute.xlu1 %v570_v2 }
  0x11   :  { %533 = vset.pattern.permute.xlu0 %v573_v10  ;;  %165 = vperm.xlu1 %528, %v208_v5   ;;  %p556_p4 = pnand %p555_p3, %p549_p0 }
  0x12   :  { %121 = vperm.xlu0 %533, %v111_v9  }
  0x15   :  { %530 = vset.pattern.permute.xlu1 %v571_v3 }
  0x16   :  { %116 = vperm.xlu0 %533, %v208_v5   ;;  %84 = vperm.xlu1 %530, %v62_v11  }
  0x1a   :  { %130 = vperm.xlu0 %533, %v112_v12   ;;  %531 = vset.pattern.permute.xlu1 %v573_v10 }
  0x1b   :  { %135 = vperm.xlu1 %531, %v113_v13  }
  0x1e   :  { %538 = vset.pattern.permute.xlu0 %v571_v3 }
  0x1f   :  { %101 = vperm.xlu0 %538, %v51_v14   ;;  %534 = vset.pattern.permute.xlu1 %v572_v6 }
  0x20   :  { %233 = vperm.xlu1 %534, %v211_v15  }
  0x23   :  { %541 = vset.pattern.permute.xlu0 %v572_v6 }
  0x24   :  { %248 = vperm.xlu0 %541, %v51_v14   ;;  %535 = vset.pattern.permute.xlu1 %v571_v3  ;;  %v105_v3 = vshrl.u32 %v53_v57, 7 }
  0x25   :  { %79 = vperm.xlu1 %535, %v112_v12  }
  0x29   :  { %536 = vset.pattern.permute.xlu1 %v570_v2 }
  0x2a   :  { %179 = vperm.xlu1 %536, %v112_v12  }
  0x2e   :  { %537 = vset.pattern.permute.xlu1 %v572_v6 }
  0x2f   :  { %228 = vperm.xlu1 %537, %v112_v12  }
  0x33   :  { %539 = vset.pattern.permute.xlu1 %v573_v10 }
  0x34   :  { %150 = vperm.xlu1 %539, %v51_v14  }
  0x38   :  { %540 = vset.pattern.permute.xlu1 %v570_v2 }
  0x39   :  { %199 = vperm.xlu1 %540, %v51_v14   ;;  %v106_v14 = vsub.s32 0, %v105_v3  ;;  %v54_v3 = vand.u32 127, %v53_v57 }
  0x3b   :  { %vm58_vm2 = vcmp.lt.s32.totalorder %v54_v3, 64 }
  0x7d   :  { %v171_v17 = vpop.permute.xlu1 %170 }
  0x7e   :  { %v71_v18 = vpop.permute.xlu0 %70  ;;  %v174_v44 = vsub.f32 %v656_v26, %v171_v17 }
  0x7f   :  { %v74_v34 = vsub.f32 %v656_v26, %v71_v18 }
  0x80   :  { %v176_v51 = vmul.f32 %v174_v44, %v174_v44 }
  0x81   :  { %v76_v39 = vmul.f32 %v74_v34, %v74_v34 }
  0x82   :  { %v220_v19 = vpop.permute.xlu1 %219 }
  0x83   :  { %v215_v20 = vpop.permute.xlu0 %214  ;;  %v223_v53 = vsub.f32 %v656_v26, %v220_v19 }
  0x84   :  { %v222_v60 = vsub.f32 %v626_v7, %v215_v20 }
  0x85   :  { %v225_v63 = vmul.f32 %v223_v53, %v223_v53 }
  0x86   :  { %v224_v8 = vmul.f32 %v222_v60, %v222_v60 }
  0x87   :  { %v66_v22 = vpop.permute.xlu1 %65 }
  0x88   :  { %v185_v23 = vpop.permute.xlu0 %184  ;;  %v73_v41 = vsub.f32 %v626_v7, %v66_v22 }
  0x89   :  { %v188_v55 = vmul.f32 %v185_v23, %v176_v51 }
  0x8a   :  { %v75_v47 = vmul.f32 %v73_v41, %v73_v41 }
  0x8b   :  { %v189_v1 = vsel %vm89_vm0, %v188_v55, 0.0 }
  0x8c   :  { %v166_v24 = vpop.permute.xlu1 %165 }
  0x8d   :  { %v122_v25 = vpop.permute.xlu0 %121  ;;  %v173_v48 = vsub.f32 %v626_v7, %v166_v24 }
  0x8e   :  { %v125_v27 = vsub.f32 %v656_v26, %v122_v25 }
  0x8f   :  { %v175_v58 = vmul.f32 %v173_v48, %v173_v48 }
  0x90   :  { %v127_v31 = vmul.f32 %v125_v27, %v125_v27 }
  0x91   :  { %v117_v28 = vpop.permute.xlu0 %116  ;;  %v85_v29 = vpop.permute.xlu1 %84 }
  0x92   :  { %v124_v30 = vsub.f32 %v626_v7, %v117_v28  ;;  %v88_v45 = vmul.f32 %v85_v29, %v76_v39 }
  0x94   :  { %v126_v32 = vmul.f32 %v124_v30, %v124_v30  ;;  %v90_v54 = vsel %vm89_vm0, %v88_v45, 0.0 }
  0x95   :  { %v131_v33 = vpop.permute.xlu0 %130 }
  0x96   :  { %v136_v35 = vpop.permute.xlu1 %135  ;;  %v138_v36 = vmul.f32 %v131_v33, %v126_v32 }
  0x97   :  { %v139_v37 = vmul.f32 %v136_v35, %v127_v31 }
  0x99   :  { %v140_v38 = vsel %vm89_vm0, %v139_v37, 0.0 }
  0x9a   :  { %v141_v40 = vadd.f32 %v140_v38, %v138_v36  ;;  %v102_v18 = vpop.permute.xlu0 %101 }
  0x9b   :  { %v234_v42 = vpop.permute.xlu1 %233  ;;  %v107_v25 = vrot.slane %v102_v18, %v106_v14 }
  0x9c   :  { %v142_v43 = vrot.slane %v141_v40, 4  ;;  %v237_v4 = vmul.f32 %v234_v42, %v225_v63 }
  0x9e   :  { %v143_v46 = vadd.f32 %v142_v43, %v141_v40  ;;  %v238_v7 = vsel %vm89_vm0, %v237_v4, 0.0 }
  0x9f   :  { %v249_v41 = vpop.permute.xlu0 %248 }
  0xa0   :  { %v144_v49 = vrot.slane %v143_v46, 2  ;;  %v80_v50 = vpop.permute.xlu1 %79  ;;  %v254_v45 = vrot.slane %v249_v41, %v106_v14 }
  0xa1   :  { %v87_v52 = vmul.f32 %v80_v50, %v75_v47 }
  0xa2   :  { %v145_v59 = vadd.f32 %v144_v49, %v143_v46 }
  0xa3   :  { %v91_v56 = vadd.f32 %v90_v54, %v87_v52 }
  0xa4   :  { %v146_v6 = vrot.slane %v145_v59, 1 }
  0xa5   :  { %v92_v61 = vrot.slane %v91_v56, 4  ;;  %v180_v62 = vpop.permute.xlu1 %179 }
  0xa6   :  { %v187_v0 = vmul.f32 %v180_v62, %v175_v58  ;;  %v147_v17 = vadd.f32 %v146_v6, %v145_v59 }
  0xa7   :  { %v93_v2 = vadd.f32 %v92_v61, %v91_v56 }
  0xa8   :  { %v190_v5 = vadd.f32 %v189_v1, %v187_v0  ;;  %v148_v28 = vmul.f32 0.5, %v147_v17 }
  0xa9   :  { %v94_v9 = vrot.slane %v93_v2, 2 }
  0xaa   :  { %v191_v10 = vrot.slane %v190_v5, 4  ;;  %v229_v11 = vpop.permute.xlu1 %228 }
  0xab   :  { %v95_v12 = vadd.f32 %v94_v9, %v93_v2  ;;  %v236_v13 = vmul.f32 %v229_v11, %v224_v8  ;;  %v373_v9 = vmul.f32 %v656_v26, %v656_v26  ;;  %v286_v11 = vld [vmem:[#allocation5] sm:$0x1] }
  0xac   :  { %v192_v15 = vadd.f32 %v191_v10, %v190_v5 }
  0xad   :  { %v239_v19 = vadd.f32 %v238_v7, %v236_v13  ;;  %v96_v20 = vrot.slane %v95_v12, 1 }
  0xae   :  { %v193_v21 = vrot.slane %v192_v15, 2 }
  0xaf   :  { %v240_v22 = vrot.slane %v239_v19, 4  ;;  %v151_v23 = vpop.permute.xlu1 %150  ;;  %v97_v24 = vadd.f32 %v96_v20, %v95_v12 }
  0xb0   :  { %v194_v27 = vadd.f32 %v193_v21, %v192_v15  ;;  %v156_v29 = vrot.slane %v151_v23, %v106_v14 }
  0xb1   :  { %v241_v30 = vadd.f32 %v240_v22, %v239_v19  ;;  %v98_v31 = vmul.f32 0.5, %v97_v24 }
  0xb2   :  { %v157_v32 = vsub.f32 %v156_v29, %v148_v28  ;;  %v195_v33 = vrot.slane %v194_v27, 1 }
  0xb3   :  { %v242_v34 = vrot.slane %v241_v30, 2  ;;  %v108_v35 = vsub.f32 %v107_v25, %v98_v31 }
  0xb4   :  { %158 = vst [vmem:[#allocation2 + $0x1] sm:$0x1] %v157_v32  ;;  %v200_v36 = vpop.permute.xlu1 %199  ;;  %v196_v37 = vadd.f32 %v195_v33, %v194_v27 }
  0xb5   :  { %v243_v38 = vadd.f32 %v242_v34, %v241_v30  ;;  %109 = vst [vmem:[#allocation2] sm:$0x1] %v108_v35  ;;  %v205_v39 = vrot.slane %v200_v36, %v106_v14 }
  0xb6   :  { %v197_v40 = vmul.f32 0.5, %v196_v37 }
  0xb7   :  { %v244_v42 = vrot.slane %v243_v38, 1 }
  0xb8   :  { %v206_v43 = vsub.f32 %v205_v39, %v197_v40 }
  0xb9   :  { %v245_v44 = vadd.f32 %v244_v42, %v243_v38 }
  0xba   :  { %207 = vst [vmem:[#allocation2 + $0x2] sm:$0x1] %v206_v43 }
  0xbb   :  { %v246_v46 = vmul.f32 0.5, %v245_v44 }
  0xbd   :  { %v255_v47 = vsub.f32 %v254_v45, %v246_v46 }
  0xbf   :  { %256 = vst [vmem:[#allocation2 + $0x3] sm:$0x1] %v255_v47 }
  0xc6   :  { %v257_v48 = vld [vmem:[#allocation2] sm:$0xf] }
  0xc7   :  { %v259_v49 = vsel %vm258_vm1, %v257_v48, -inf }
  0xc8   :  { %v260_v50 = vrot.slane %v259_v49, 4 }
  0xca   :  { %v261_v51 = vmax.f32 %v259_v49, %v260_v50 }
  0xcc   :  { %v262_v52 = vrot.slane %v261_v51, 2 }
  0xce   :  { %v263_v53 = vmax.f32 %v261_v51, %v262_v52 }
  0xd0   :  { %v264_v54 = vrot.slane %v263_v53, 1 }
  0xd2   :  { %v265_v55 = vmax.f32 %v263_v53, %v264_v54 }
  0xd4   :  { %v266_v56 = vsub.f32 %v257_v48, %v265_v55 }
  0xd6   :  { %v267_v58 = vmul.f32 1.442695, %v266_v56 }
  0xd8   :  { %542 = vpow2.f32 %v267_v58 }
  0xe5   :  { %v543_v59 = vpop.eup %542 }
  0xe6   :  { %v269_v60 = vsel %vm258_vm1, %v543_v59, 0.0 }
  0xe7   :  { %v270_v61 = vrot.slane %v269_v60, 4 }
  0xe9   :  { %v271_v62 = vadd.f32 %v270_v61, %v269_v60 }
  0xeb   :  { %v272_v63 = vrot.slane %v271_v62, 2 }
  0xed   :  { %v273_v0 = vadd.f32 %v272_v63, %v271_v62 }
  0xef   :  { %v274_v1 = vrot.slane %v273_v0, 1 }
  0xf1   :  { %v275_v2 = vadd.f32 %v274_v1, %v273_v0 }
  0xf3   :  { %544 = vrcp.f32 %v275_v2 }
  0xf4   :  { %546 = vlog2.f32 %v275_v2 }
 0x100   :  { %v545_v4 = vpop.eup %544 }
 0x101   :  { %v547_v5 = vpop.eup %546  ;;  %v278_v6 = vmul.f32 %v545_v4, %v543_v59 }
 0x102   :  { %v283_v8 = vmul.f32 0.6931472, %v547_v5 }
 0x103   :  { %508 = vmatprep.subr.msk.mxu0 %vm58_vm2, %v278_v6  ;;  %513 = vmatprep.subr.msk.mxu1 %vm58_vm2, %v278_v6 }
 0x104   :  { %v284_v10 = vadd.f32 %v283_v8, %v265_v55  ;;  %509 = vmatpush3.xpose.msk.msra.mxu0 %vm58_vm2, %v278_v6  ;;  %514 = vmatpush3.xpose.msk.msra.mxu1 %vm58_vm2, %v278_v6 }
 0x106   :  { %v285_v12 = vsel %vm58_vm2, %v284_v10, 0.0 }
 0x107   :  { %v287_v13 = vadd.f32 %v286_v11, %v285_v12  ;;  %511 = vmatmul.mubr.f32.vlgmr.msra.gmra.mxu0 %v656_v26  ;;  %516 = vmatmul.mubr.f32.vlgmr.msra.gmra.mxu1 %v373_v9 }
 0x109   :  { %288 = vst [vmem:[#allocation5] sm:$0x1] %v287_v13 }
 0x110   :  { %v458_v57 = vld [vmem:[#allocation5] sm:$0x1] }
 0x111   :  { %v459_v14 = vsel %vm89_vm0, %v458_v57, 0.0 }
 0x112   :  { %460 = vadd.xlane.f32.xlu1 %v459_v14 }
 0x19b   :  { %v461_v26 = vpop.xlane.xlu1 %460 }
 0x19c   :  { %463 = vst.msk [vmem:[#allocation6] sm:$0x1] %vm462_vm5, %v461_v26 }
 0x19d   :  { %559 = shalt.err (!%p556_p4)
}
 0x19e   :  { %481 = dma.vmem_to_hbm [thread:$0]  %s479_s20, 16, %s711_s4, [#allocation7]   ;;  %v290_v7 = vld [vmem:[#allocation3 + $0x8] sm:$0x1]  ;;  %v375_v16 = vld [vmem:[#allocation4 + $0x8] sm:$0x1] }
 0x19f   :  { %v289_v18 = vld [vmem:[#allocation3] sm:$0xff]  ;;  %v374_v19 = vld [vmem:[#allocation4] sm:$0xff] }
 0x1c7   :  { %v512_v15 = vpop.f32.mrf.mxu0  ;;  %v517_v17 = vpop.f32.mrf.mxu1 }
 0x1c8   :  { %v367_v20 = vadd.f32 %v512_v15, %v290_v7  ;;  %v452_v21 = vadd.f32 %v517_v17, %v375_v16 }
 0x1c9   :  { %v357_v22 = vpop.f32.mrf.mxu0  ;;  %v442_v23 = vpop.f32.mrf.mxu1 }
 0x1ca   :  { %371 = vst.msk [vmem:[#allocation3 + $0x8] sm:$0x1] %vm44_vm3, %v367_v20  ;;  %454 = vst.msk [vmem:[#allocation4 + $0x8] sm:$0x1] %vm44_vm3, %v452_v21  ;;  %v366_v24 = vadd.f32 %v357_v22, %v289_v18  ;;  %v451_v25 = vadd.f32 %v442_v23, %v374_v19 }
 0x1cc   :  { %369 = vst.msk [vmem:[#allocation3] sm:$0xff] %vm42_vm4, %v366_v24  ;;  %453 = vst.msk [vmem:[#allocation4] sm:$0xff] %vm42_vm4, %v451_v25 }
 0x1d1   :  { %v465_v27 = vld [vmem:[#allocation3 + $0x8] sm:$0x1]  ;;  %v469_v28 = vld [vmem:[#allocation4 + $0x8] sm:$0x1] }
 0x1d2   :  { %467 = vst.msk [vmem:[%s712_s5 + $0x8] sm:$0x1] %vm44_vm3, %v465_v27  ;;  %471 = vst.msk [vmem:[%s713_s6 + $0x8] sm:$0x1] %vm44_vm3, %v469_v28 }
 0x1d3   :  { %v464_v29 = vld [vmem:[#allocation3] sm:$0xff]  ;;  %v468_v30 = vld [vmem:[#allocation4] sm:$0xff] }
 0x1d4   :  { %466 = vst.msk [vmem:[%s712_s5] sm:$0xff] %vm42_vm4, %v464_v29  ;;  %470 = vst.msk [vmem:[%s713_s6] sm:$0xff] %vm42_vm4, %v468_v30 }
 0x1d5   :  { %568 = dma.done.wait [#allocation7], 16  }
 0x1d6   :  { %569 = vsyncadd [#allocation7], 4294967280 }
 0x1d7   :  { %493 = vsyncpa [#allocation7], 1 }

</bundles_post_ra>
